<compile_context>
chip_gen: v6e
topology: v6e:2x2x1
jax: 0.10.0
libtpu: 0.0.40
codegen_flags: <defaults>
</compile_context>

<pallas_src>
import numpy as np
import jax
import jax.numpy as jnp
from jax.experimental import pallas as pl
from jax.experimental.pallas import tpu as pltpu


# ----------------------------------------------------------------------------
# Host-side position construction (mirrors build()/_broadcast(); runs once at
# module construction time, not part of the forward hot path).
# ----------------------------------------------------------------------------
def _discretize_interval(axis_num, patch_size, depth):
    axis_from, axis_to = [], []
    for index in range(axis_num // patch_size):
        from_pos = index * patch_size / axis_num
        to_pos = (index + 1) * patch_size / axis_num
        axis_from.append(round(from_pos * depth))
        axis_to.append(round(to_pos * depth))
    return np.asarray(axis_from, np.int32), np.asarray(axis_to, np.int32)


def build_positions(height, width, patch_size, depth, mode, key):
    rows_from, rows_to = _discretize_interval(height, patch_size, depth)
    cols_from, cols_to = _discretize_interval(width, patch_size, depth)
    hn, wn = height // patch_size, width // patch_size

    if mode == "training":
        # _randomized_positions: uniform(0,1) * (to - from), truncated to int32
        # TODO(synk): Gato re-draws these every training forward; here they are
        # sampled once at build time (outside the kernel), like the original
        # module's build().
        kr, kc = jax.random.split(key)
        row_u = np.asarray(jax.random.uniform(kr, (hn,), jnp.float32))
        col_u = np.asarray(jax.random.uniform(kc, (wn,), jnp.float32))
        row_pos = rows_from + (row_u * (rows_to - rows_from)).astype(np.int32)
        col_pos = cols_from + (col_u * (cols_to - cols_from)).astype(np.int32)
    else:
        # _rounded_mean_positions
        row_pos = np.round((rows_from + rows_to).astype(np.float32) / 2).astype(np.int32)
        col_pos = np.round((cols_from + cols_to).astype(np.float32) / 2).astype(np.int32)

    # _broadcast: row value repeated across columns, col values tiled across rows
    row_full = np.repeat(row_pos, wn).astype(np.int32)   # (hn*wn,)
    col_full = np.tile(col_pos, hn).astype(np.int32)     # (hn*wn,)
    return row_full, col_full


# ----------------------------------------------------------------------------
# Hot-path kernel: out = x + pos  (pos broadcast over the batch-tile dim).
# ----------------------------------------------------------------------------
def _add_pos_kernel(pos_ref, x_ref, o_ref):
    o_ref[...] = (x_ref[...] + pos_ref[...]).astype(o_ref.dtype)


_TARGET_BLOCK = 8 << 20      # desired bytes per x / out block
_INNER_TARGET = 4 << 20      # cap on a single (1, tn, d) row-block
_VMEM_LIMIT = 48 << 20       # fits v5e / v6e (128 MiB) and v7x (64 MiB)


def _ceil_div(a, b):
    return -(-a // b)


def patch_position_encoding(inputs, row_pos, col_pos, row_table, col_table):
    b, n, d = inputs.shape
    depth = row_table.shape[0]
    dtype = inputs.dtype
    itemsize = jnp.dtype(dtype).itemsize

    # --- Batch-invariant positional slab, computed once (hoisted gather+add).
    # Defensive clamp (PyTorch nn.Embedding would raise on OOB indices).
    row_pos = jnp.clip(row_pos.astype(jnp.int32), 0, depth - 1)
    col_pos = jnp.clip(col_pos.astype(jnp.int32), 0, depth - 1)
    pos_embed = (row_table[row_pos] + col_table[col_pos]).astype(dtype)   # (n, d)

    use_3d = (d % 128 == 0)

    if use_3d:
        # --- Native (b, n, d) layout, 3-D blocks (tb, tn, d): no relayout copy.
        row_bytes = n * d * itemsize
        if row_bytes <= _INNER_TARGET:
            tn = n
        else:
            tn = max(8, ((_INNER_TARGET // (d * itemsize)) // 8) * 8)
            if tn >= n:
                tn = n
        inner_bytes = tn * d * itemsize
        tb = max(1, min(_TARGET_BLOCK // inner_bytes, b))
        if b >= 2:
            tb = max(1, min(tb, _ceil_div(b, 2)))   # >= 2 batch grid steps
        grid = (pl.cdiv(b, tb), pl.cdiv(n, tn))
        in_specs = [
            pl.BlockSpec((1, tn, d), lambda i, j: (0, j, 0)),    # pos (resident)
            pl.BlockSpec((tb, tn, d), lambda i, j: (i, j, 0)),   # x
        ]
        out_spec = pl.BlockSpec((tb, tn, d), lambda i, j: (i, j, 0))
        pos_in = pos_embed.reshape(1, n, d)
        x_in = inputs
        out_shape = jax.ShapeDtypeStruct((b, n, d), dtype)
    else:
        # --- Tiny / unaligned d: lane-dense flatten so stores are unmasked.
        flat = n * d
        if 8 * flat * itemsize <= _TARGET_BLOCK or flat <= 128:
            tl = flat
        else:
            tl = max(128, ((_TARGET_BLOCK // (8 * itemsize)) // 128) * 128)
            if tl >= flat:
                tl = flat
        inner_bytes = tl * itemsize
        if b <= 8:
            tb = b                                   # block dim == full array dim
        else:
            desired = max(8, ((_TARGET_BLOCK // inner_bytes) // 8) * 8)
            cap = max(8, (_ceil_div(b, 2) // 8) * 8)  # >= 2 batch grid steps
            tb = min(desired, cap)
        grid = (pl.cdiv(b, tb), pl.cdiv(flat, tl))
        in_specs = [
            pl.BlockSpec((1, tl), lambda i, j: (0, j)),     # pos (resident)
            pl.BlockSpec((tb, tl), lambda i, j: (i, j)),    # x
        ]
        out_spec = pl.BlockSpec((tb, tl), lambda i, j: (i, j))
        pos_in = pos_embed.reshape(1, flat)
        x_in = inputs.reshape(b, flat)
        out_shape = jax.ShapeDtypeStruct((b, flat), dtype)

    # TODO(synk): if the caller allows donation of `inputs`, pass
    # input_output_aliases={1: 0} here to avoid allocating a second b*n*d
    # HBM buffer (no traffic saving, just allocator pressure).
    out = pl.pallas_call(
        _add_pos_kernel,
        out_shape=out_shape,
        grid=grid,
        in_specs=in_specs,
        out_specs=out_spec,
        compiler_params=pltpu.CompilerParams(
            dimension_semantics=("parallel", "parallel"),
            vmem_limit_bytes=_VMEM_LIMIT,
        ),
    )(pos_in, x_in)

    return out.reshape(b, n, d)


if __name__ == "__main__":
    # Small config consistent with the module:
    #   img_height = img_width = 16, patch_size = 4  -> 4x4 = 16 patches
    #   discretize_depth = 128, batch = 2
    H = W = 16
    P = 4
    DEPTH = 128
    B = 2
    MODE = "training"   # module default; randomness made deterministic via PRNGKey(0)

    key = jax.random.PRNGKey(0)
    k_pos, k_row, k_col, k_x = jax.random.split(key, 4)

    # Positions (built once in __init__/build(), reused every forward).
    row_pos_np, col_pos_np = build_positions(H, W, P, DEPTH, MODE, k_pos)
    row_pos = jnp.asarray(row_pos_np)
    col_pos = jnp.asarray(col_pos_np)
    n_patches = (H // P) * (W // P)

    fwd = jax.jit(patch_position_encoding)

    ok = True
    # Exercise both paths: d = 32 (flatten fallback) and d = 128 (3-D path,
    # the real-Gato layout where layer_width % 128 == 0).
    for D in (32, 128):
        kr, kc, kx = jax.random.split(jax.random.fold_in(key, D), 3)
        row_table = jax.random.normal(kr, (DEPTH, D), dtype=jnp.float32)
        col_table = jax.random.normal(kc, (DEPTH, D), dtype=jnp.float32)
        x = jax.random.normal(kx, (B, n_patches, D), dtype=jnp.float32)

        out = fwd(x, row_pos, col_pos, row_table, col_table)
        out = jax.block_until_ready(out)

        # Reference check (plain JAX gather + add).
        ref = x + row_table[row_pos] + col_table[col_pos]
        np.testing.assert_allclose(np.asarray(out), np.asarray(ref),
                                   rtol=1e-6, atol=1e-6)

    print("KERNEL_OK")
</pallas_src>

<mosaic_0001>
module attributes {stable_mosaic.version = 11 : i64} {
  func.func @_add_pos_kernel(%arg0: i32, %arg1: i32, %arg2: memref<1x512xf32, #tpu.memory_space<vmem>>, %arg3: memref<2x512xf32, #tpu.memory_space<vmem>>, %arg4: memref<2x512xf32, #tpu.memory_space<vmem>>) attributes {dimension_semantics = [#tpu.dimension_semantics<parallel>, #tpu.dimension_semantics<parallel>], iteration_bounds = array<i64: 1, 1>, scalar_prefetch = 0 : i64, scratch_operands = 0 : i64, tpu.core_type = #tpu.core_type<tc>, window_params = [{transform_indices = @transform_0, window_bounds = array<i64: 1, 512>}, {transform_indices = @transform_1, window_bounds = array<i64: 2, 512>}, {transform_indices = @transform_2, window_bounds = array<i64: 2, 512>}]} {
    %c0 = arith.constant 0 : index
    %c0_0 = arith.constant 0 : index
    %0 = vector.load %arg3[%c0, %c0_0] : memref<2x512xf32, #tpu.memory_space<vmem>>, vector<2x512xf32>
    %c0_1 = arith.constant 0 : index
    %c0_2 = arith.constant 0 : index
    %1 = vector.load %arg2[%c0_1, %c0_2] : memref<1x512xf32, #tpu.memory_space<vmem>>, vector<1x512xf32>
    %2 = vector.broadcast %1 : vector<1x512xf32> to vector<2x512xf32>
    %3 = arith.addf %0, %2 : vector<2x512xf32>
    %c0_3 = arith.constant 0 : index
    %c0_4 = arith.constant 0 : index
    %4 = vector.load %arg4[%c0_3, %c0_4] : memref<2x512xf32, #tpu.memory_space<vmem>>, vector<2x512xf32>
    tpu.vector_store %arg4[%c0_3, %c0_4], %3 {strides = array<i32>} : memref<2x512xf32, #tpu.memory_space<vmem>>, vector<2x512xf32>,
    return
  }
  func.func @transform_0(%arg0: i32, %arg1: i32) -> (i32, i32) {
    %c0_i32 = arith.constant 0 : i32
    %c0_i32_0 = arith.constant 0 : i32
    return %c0_i32, %arg1 : i32, i32
  }
  func.func @transform_1(%arg0: i32, %arg1: i32) -> (i32, i32) {
    %c0_i32 = arith.constant 0 : i32
    return %arg0, %arg1 : i32, i32
  }
  func.func @transform_2(%arg0: i32, %arg1: i32) -> (i32, i32) {
    %c0_i32 = arith.constant 0 : i32
    return %arg0, %arg1 : i32, i32
  }
}

</mosaic_0001>

<bundles_post_ra>
// kernel: patch_position_encoding.1
= control target key start
LH: loop header
LB: loop body
LE: loop exit
PB: predicated region body
PF: predicated region fallthrough
CT: control target
= control target key end

     0   :  { %v14_v0 = vlaneseq  ;;  %v55_v1 = vmov 1983009808   ;;  %s80_s0 = inlined_call_operand.vmem [shape: f32[1,512], index: 0, kind: input, shape index: {}]   ;;  %s81_s1 = inlined_call_operand.vmem [shape: f32[2,512], index: 1, kind: input, shape index: {}]   ;;  %s82_s2 = inlined_call_operand.vmem [shape: f32[2,512], index: 2, kind: output, shape index: {}]  }
   0x1   :  { %v33_v2 = vunpack.c.l.s4 %v55_v1  ;;  %v12_v4 = vld [vmem:[%s80_s0] sm:$0xf] }
   0x2   :  { %v15_v3 = vshrl.u32 %v14_v0, 7  ;;  %v11_v19 = vld [vmem:[%s81_s1] sm:$0xff] }
   0x3   :  { %v34_v5 = vunpack.c.0.s8 %v33_v2 }
   0x4   :  { %v16_v6 = vsub.s32 0, %v15_v3  ;;  %v20_v7 = vsub.s32 1, %v15_v3  ;;  %v24_v8 = vsub.s32 2, %v15_v3  ;;  %v28_v9 = vsub.s32 3, %v15_v3 }
   0x5   :  { %v37_v10 = vsub.s32 %v34_v5, %v15_v3 }
   0x6   :  { %v17_v11 = vrot.slane %v12_v4, %v16_v6  ;;  %v21_v12 = vrot.slane %v12_v4, %v20_v7  ;;  %v25_v13 = vrot.slane %v12_v4, %v24_v8  ;;  %v29_v14 = vrot.slane %v12_v4, %v28_v9 }
   0x8   :  { %v30_v15 = vcombine.low %v17_v11, %v21_v12  ;;  %v31_v16 = vcombine.low %v25_v13, %v29_v14 }
   0xa   :  { %v38_v17 = vrot.slane %v30_v15, %v37_v10  ;;  %v45_v18 = vrot.slane %v31_v16, %v37_v10 }
   0xc   :  { %v46_v20 = vcombine.low %v38_v17, %v45_v18 }
   0xe   :  { %v48_v21 = vadd.f32 %v46_v20, %v11_v19 }
  0x10   :  { %49 = vst [vmem:[%s82_s2] sm:$0xff] %v48_v21 }

</bundles_post_ra>
